<compile_context>
chip_gen: v5e
topology: v5e:2x2
jax: 0.10.0
libtpu: 0.0.40
codegen_flags: <defaults>
</compile_context>

<pallas_src>
import functools

import jax
import jax.numpy as jnp
from jax.experimental import pallas as pl
from jax.experimental.pallas import tpu as pltpu


def nlinear_kernel(x_ref, w_ref, b_ref, o_ref, *, cast_bf16):
    # x_ref: (L, TC)  one batch element, one channel tile
    # w_ref: (P, L)   nn.Linear(seq_len, pred_len).weight  (resident in VMEM)
    # b_ref: (P, 1)   bias (reshaped for lane broadcast)
    # o_ref: (P, TC)  output tile
    L = x_ref.shape[0]
    last = x_ref[pl.ds(L - 1, 1), :]                  # (1, TC) == seq_last per lane
    xc = x_ref[...] - last                            # (L, TC) centered input
    w = w_ref[...]
    if cast_bf16:
        xc = xc.astype(jnp.bfloat16)
        w = w.astype(jnp.bfloat16)
    # Linear along the seq axis on the MXU: y[p, c] = sum_l W[p, l] * xc[l, c]
    y = jnp.dot(w, xc, preferred_element_type=jnp.float32)   # (P, TC) f32
    o_ref[...] = (y + b_ref[...] + last).astype(o_ref.dtype)


def _choose_channel_tile(C, L, P, itemsize, vmem_budget=24 * 1024 * 1024):
    """Largest lane-dense channel tile whose per-step VMEM footprint fits budget."""
    if C <= 256:
        # Single full-width block along C (block dim == full array dim is legal;
        # lanes < 128 just become masked partial stores).
        return C
    # Per-step footprint: double-buffered x and out tiles + resident W, bias
    # (counted double-buffered to be conservative).
    weight_bytes = 2 * itemsize * (P * L + P)

    def fits(tc):
        return 2 * itemsize * (L + P) * tc + weight_bytes <= vmem_budget

    for tc in (2048, 1024, 512, 256, 128):
        if tc <= C and fits(tc):
            return tc
    return 128


def nlinear_forward(x_enc, weight, bias):
    """x_enc: [B, L, C], weight: [P, L], bias: [P] -> [B, P, C]"""
    B, L, C = x_enc.shape
    P = weight.shape[0]
    itemsize = x_enc.dtype.itemsize

    bias2d = bias.reshape(P, 1)

    TC = _choose_channel_tile(C, L, P, itemsize)
    grid = (B, pl.cdiv(C, TC))

    # Feed the MXU in bf16 only when the matmul is big enough to matter
    # (small L, P shapes are purely HBM-bound; keep full f32 there).
    cast_bf16 = (L >= 256 and P >= 256 and x_enc.dtype == jnp.float32)

    cost = pl.CostEstimate(
        flops=2 * P * L * B * C,
        transcendentals=0,
        bytes_accessed=itemsize * (B * L * C + P * L + P + B * P * C),
    )

    out = pl.pallas_call(
        functools.partial(nlinear_kernel, cast_bf16=cast_bf16),
        out_shape=jax.ShapeDtypeStruct((B, P, C), x_enc.dtype),
        grid_spec=pltpu.PrefetchScalarGridSpec(
            num_scalar_prefetch=0,
            grid=grid,
            in_specs=[
                # x: one batch element, one channel tile; batch dim squeezed.
                pl.BlockSpec((None, L, TC), lambda b, j: (b, 0, j)),
                # weight / bias: constant index map -> DMA'd once, stay resident.
                pl.BlockSpec((P, L), lambda b, j: (0, 0)),
                pl.BlockSpec((P, 1), lambda b, j: (0, 0)),
            ],
            out_specs=pl.BlockSpec((None, P, TC), lambda b, j: (b, 0, j)),
        ),
        compiler_params=pltpu.CompilerParams(
            # Both grid axes are independent -> shard across TensorCores (v7x).
            dimension_semantics=("parallel", "parallel"),
            vmem_limit_bytes=32 * 1024 * 1024,   # tiles budgeted to ~24 MiB; fits v7x
        ),
        cost_estimate=cost,
    )(x_enc, weight, bias2d)

    return out


if __name__ == "__main__":
    # Small deterministic config
    B, SEQ_LEN, PRED_LEN, C = 2, 8, 4, 16

    key = jax.random.PRNGKey(0)
    k_x, k_w, k_b = jax.random.split(key, 3)

    # Deterministic parameter init (mimics nn.Linear uniform(-1/sqrt(L), 1/sqrt(L)))
    bound = 1.0 / jnp.sqrt(jnp.float32(SEQ_LEN))
    weight = jax.random.uniform(k_w, (PRED_LEN, SEQ_LEN), jnp.float32, -bound, bound)
    bias = jax.random.uniform(k_b, (PRED_LEN,), jnp.float32, -bound, bound)

    # Inputs (x_mark_enc / x_dec / x_mark_dec / mask are unused by the forward pass)
    x_enc = jax.random.normal(k_x, (B, SEQ_LEN, C), jnp.float32)

    out = jax.block_until_ready(nlinear_forward(x_enc, weight, bias))

    # Pure-JAX reference check
    seq_last = x_enc[:, -1:, :]
    ref = jnp.einsum("pl,blc->bpc", weight, x_enc - seq_last) \
        + bias[None, :, None] + seq_last
    assert out.shape == (B, PRED_LEN, C)
    assert jnp.allclose(out, ref, atol=1e-5, rtol=1e-5)

    print("KERNEL_OK")
</pallas_src>

<mosaic_0001>
module attributes {stable_mosaic.version = 11 : i64} {
  func.func @nlinear_kernel(%arg0: i32, %arg1: i32, %arg2: memref<1x8x16xf32, #tpu.memory_space<vmem>>, %arg3: memref<4x8xf32, #tpu.memory_space<vmem>>, %arg4: memref<4x1xf32, #tpu.memory_space<vmem>>, %arg5: memref<1x4x16xf32, #tpu.memory_space<vmem>>) attributes {dimension_semantics = [#tpu.dimension_semantics<parallel>, #tpu.dimension_semantics<parallel>], iteration_bounds = array<i64: 2, 1>, scalar_prefetch = 0 : i64, scratch_operands = 0 : i64, tpu.core_type = #tpu.core_type<tc>, window_params = [{transform_indices = @transform_0, window_bounds = array<i64: 1, 8, 16>}, {pipeline_mode = #tpu.pipeline_mode<synchronous>, transform_indices = @transform_1, window_bounds = array<i64: 4, 8>}, {pipeline_mode = #tpu.pipeline_mode<synchronous>, transform_indices = @transform_2, window_bounds = array<i64: 4, 1>}, {transform_indices = @transform_3, window_bounds = array<i64: 1, 4, 16>}]} {
    %c0 = arith.constant 0 : index
    %c7 = arith.constant 7 : index
    %c0_0 = arith.constant 0 : index
    %0 = vector.load %arg2[%c0, %c7, %c0_0] : memref<1x8x16xf32, #tpu.memory_space<vmem>>, vector<1x1x16xf32>
    %1 = vector.shape_cast %0 : vector<1x1x16xf32> to vector<1x16xf32>
    %c0_1 = arith.constant 0 : index
    %c0_2 = arith.constant 0 : index
    %c0_3 = arith.constant 0 : index
    %2 = vector.load %arg2[%c0_1, %c0_2, %c0_3] : memref<1x8x16xf32, #tpu.memory_space<vmem>>, vector<1x8x16xf32>
    %3 = vector.shape_cast %2 : vector<1x8x16xf32> to vector<8x16xf32>
    %4 = vector.broadcast %1 : vector<1x16xf32> to vector<8x16xf32>
    %5 = arith.subf %3, %4 : vector<8x16xf32>
    %c0_4 = arith.constant 0 : index
    %c0_5 = arith.constant 0 : index
    %6 = vector.load %arg3[%c0_4, %c0_5] : memref<4x8xf32, #tpu.memory_space<vmem>>, vector<4x8xf32>
    %cst = arith.constant dense<0.000000e+00> : vector<4x16xf32>
    %7 = tpu.matmul %6, %5, %cst {dimension_numbers = #tpu.dot_dimension_numbers<[1], [0], [0], [1], [0, 0, 1, 1], [], []>} : vector<4x8xf32>, vector<8x16xf32>, vector<4x16xf32> -> vector<4x16xf32>
    %c0_6 = arith.constant 0 : index
    %c0_7 = arith.constant 0 : index
    %8 = vector.load %arg4[%c0_6, %c0_7] : memref<4x1xf32, #tpu.memory_space<vmem>>, vector<4x1xf32>
    %9 = vector.broadcast %8 : vector<4x1xf32> to vector<4x16xf32>
    %10 = arith.addf %7, %9 : vector<4x16xf32>
    %11 = vector.broadcast %1 : vector<1x16xf32> to vector<4x16xf32>
    %12 = arith.addf %10, %11 : vector<4x16xf32>
    %c0_8 = arith.constant 0 : index
    %c0_9 = arith.constant 0 : index
    %c0_10 = arith.constant 0 : index
    %13 = vector.load %arg5[%c0_8, %c0_9, %c0_10] : memref<1x4x16xf32, #tpu.memory_space<vmem>>, vector<1x4x16xf32>
    %14 = vector.shape_cast %13 : vector<1x4x16xf32> to vector<4x16xf32>
    %15 = vector.shape_cast %12 : vector<4x16xf32> to vector<1x4x16xf32>
    tpu.vector_store %arg5[%c0_8, %c0_9, %c0_10], %15 {strides = array<i32>} : memref<1x4x16xf32, #tpu.memory_space<vmem>>, vector<1x4x16xf32>,
    return
  }
  func.func @transform_0(%arg0: i32, %arg1: i32) -> (i32, i32, i32) {
    %c0_i32 = arith.constant 0 : i32
    %c0_i32_0 = arith.constant 0 : i32
    return %arg0, %c0_i32, %arg1 : i32, i32, i32
  }
  func.func @transform_1(%arg0: i32, %arg1: i32) -> (i32, i32) {
    %c0_i32 = arith.constant 0 : i32
    %c0_i32_0 = arith.constant 0 : i32
    %c0_i32_1 = arith.constant 0 : i32
    return %c0_i32, %c0_i32_0 : i32, i32
  }
  func.func @transform_2(%arg0: i32, %arg1: i32) -> (i32, i32) {
    %c0_i32 = arith.constant 0 : i32
    %c0_i32_0 = arith.constant 0 : i32
    %c0_i32_1 = arith.constant 0 : i32
    return %c0_i32, %c0_i32_0 : i32, i32
  }
  func.func @transform_3(%arg0: i32, %arg1: i32) -> (i32, i32, i32) {
    %c0_i32 = arith.constant 0 : i32
    %c0_i32_0 = arith.constant 0 : i32
    return %arg0, %c0_i32, %arg1 : i32, i32, i32
  }
}

</mosaic_0001>

<bundles_post_ra>
// kernel: tpu_custom_call.1
= control target key start
LH: loop header
LB: loop body
LE: loop exit
PB: predicated region body
PF: predicated region fallthrough
CT: control target
= control target key end

     0   :  { %8 = vsyncpa [#allocation3], 0  ;;  %s681_s0 = inlined_call_operand.hbm [shape: f32[2,8,16], index: 0, kind: input, shape index: {}]   ;;  %s682_s1 = inlined_call_operand.vmem [shape: f32[4,8], index: 1, kind: input, shape index: {}]   ;;  %s683_s2 = inlined_call_operand.vmem [shape: f32[4,1], index: 2, kind: input, shape index: {}]   ;;  %s684_s3 = inlined_call_operand.hbm [shape: f32[2,4,16], index: 3, kind: output, shape index: {}]  }
   0x1   :  { %10 = vsyncpa [#allocation3 + $0x1], 0 }
   0x2   :  { %11 = vsyncpa [#allocation4], 0 }
   0x3   :  { %13 = vsyncpa [#allocation4 + $0x1], 0  ;;  %s554_s12 = smov 0   ;;  %s556_s13 = smov 0  }
   0x4   :  { %s558_s14 = smov 0   ;;  %s560_s15 = smov 0  }
   0x5   :  { %s562_s16 = smov 0   ;;  %s564_s17 = smov 0  }
   0x6 LB: > { %s340_s18 = sadd.s32 4294967295, %s531_s17   ;;  %s341_s19 = sadd.s32 4294967294, %s531_s17   ;;  %s531_s17 = sphi %s564_s17, %s19_s17   ;;  %s527_s16 = sphi %s562_s16, %s693_s16   ;;  %s523_s15 = sphi %s560_s15, %s692_s15   ;;  %s519_s14 = sphi %s558_s14, %s691_s14   ;;  %s515_s13 = sphi %s556_s13, %s690_s13   ;;  %s511_s12 = sphi %s554_s12, %s689_s12  }
   0x7   : > { %s31_s20 = sadd.s32 1, %s527_s16  ;;  %s40_s21 = sadd.s32 1, %s519_s14 }
   0x8   : > { %p33_p0 = scmp.ge.s32.totalorder %s31_s20, 2  ;;  %p47_p1 = scmp.ne.s32.totalorder %s519_s14, %s515_s13 }
   0x9   : > { %p48_p2 = scmp.eq.s32.totalorder %s531_s17, 0  ;;  %p53_p3 = scmp.ne.s32.totalorder %s515_s13, %s511_s12 }
   0xa   : > { %s695_s20 = smov (%p33_p0, %s31_s20), 0  ;;  %p54_p5 = scmp.eq.s32.totalorder %s340_s18, 0 }
   0xb   : > { %p595_p4 = por %p48_p2, %p47_p1  ;;  %s35_s23 = ssub.s32 %s527_s16, %s695_s20 }
   0xc   : > { %p121_p6 = scmp.eq.s32.totalorder %s340_s18, 1  ;;  %p38_p7 = scmp.eq.s32.totalorder %s35_s23, 0 }
   0xd   : > { %p601_p8 = por %p54_p5, %p53_p3  ;;  %p127_p10 = scmp.eq.s32.totalorder %s341_s19, 1 }
   0xe   : > { %p605_p9 = por %p121_p6, %p47_p1  ;;  %p343_p12 = scmp.ge.s32.totalorder %s531_s17, 2 }
   0xf   : > { %s610_s26 = scalar_select %p38_p7, %s519_s14, %s40_s21  }
  0x10   : > { %p612_p11 = por %p127_p10, %p53_p3  ;;  %p366_p13 = scmp.lt.s32.totalorder %s531_s17, 2 }
  0x11   : > { %s153_s28 = sand.u32 1, %s519_s14   ;;  %s345_s30 = sshll.u32 %s527_s16, 3 }
  0x12   : > { %s344_s29 = sshll.u32 %s153_s28, 3  ;;  %s162_s6 = scalar_lea.hbm %s681_s0, %s345_s30 }
  0x13   : > { %s157_s7 = scalar_lea.vmem [#allocation2], %s344_s29  ;;  %s164_s9 = sshll.u32 %s162_s6, 4  ;;  %s165_s9 = int_to_ptr.hbm [resolvable:$true] %s164_s9 }
  0x14   : > { %s166_s8 = sshll.u32 %s157_s7, 4  ;;  %p359_p0 = pnand %p366_p13, %p595_p4  ;;  %s167_s8 = int_to_ptr.vmem [resolvable:$true] %s166_s8 }
  0x15   : > { %p346_p1 = scmp.ge.s32.totalorder %s531_s17, 1  ;;  %p171_p2 = scmp.lt.s32.totalorder %s531_s17, 3 }
  0x16   : > { %s154_s10 = scalar_lea.sflag [#allocation3], %s153_s28 }
  0x17   : > { %361 = dma.hbm_to_vmem [thread:$0]  (!%p359_p0), %s165_s9, 128, %s167_s8, %s154_s10  }
  0x18   : > { %p172_p3 = pnand %p346_p1, %p171_p2 }
  0x19   : > { %s628_s11 = sand.u32 (!%p172_p3), 1, %s515_s13  }
  0x1a   : > { %175 = sbr.rel (%p172_p3) target bundleno = 170 (0xaa), region = 32  ;;  %s347_s18 = sshll.u32 (!%p172_p3), %s628_s11, 3 }
  0x1b   : > { %s178_s19 = scalar_lea.sflag (!%p172_p3), [#allocation3], %s628_s11  ;;  %s181_s21 = scalar_lea.vmem (!%p172_p3), [#allocation2], %s347_s18 }
  0x1f   : > { %502 = dma.done.wait (%p601_p8), %s178_s19, 128  }
  0x20   : > { %504 = vsyncadd (%p601_p8), %s178_s19, 4294967168  ;;  %v533_v0 = vmov 0   ;;  %v206_v1 = vld [vmem:[%s181_s21] sm:$0xff]  ;;  %vm216_vm0 = vcmask 64512   ;;  %s348_s24 = sshll.u32 %s628_s11, 2  ;;  %s351_s30 = sshll.u32 %s523_s15, 2 }
  0x21   : > { %417 = vset.pattern.permute.xlu0 %v533_v0  ;;  %v418_v2 = vld [vmem:[%s181_s21 + $0x7] ss:$0 sm:$0xff]  ;;  %v210_v3 = vld [vmem:[%s683_s2] sm:$0xf]  ;;  %s255_s6 = scalar_lea.hbm %s684_s3, %s351_s30  ;;  %s204_s7 = scalar_lea.vmem [#allocation5], %s348_s24  ;;  %vm241_vm1 = vcmask 125952  }
  0x22   : > { %v208_v4 = vsub.f32 %v206_v1, %v418_v2  ;;  %v209_v5 = vld [vmem:[%s682_s1] sm:$0xf]  ;;  %213 = vperm.xlu0 %417, %v210_v3   ;;  %s257_s8 = sshll.u32 %s204_s7, 4  ;;  %s259_s9 = sshll.u32 %s255_s6, 4  ;;  %s258_s8 = int_to_ptr.vmem [resolvable:$true] %s257_s8  ;;  %s260_s9 = int_to_ptr.hbm [resolvable:$true] %s259_s9 }
  0x23   : > { %s244_s10 = scalar_lea.sflag [#allocation4], %s628_s11  ;;  %s463_s18 = sshra.s32 %s260_s9, 4  ;;  %s464_s18 = int_to_ptr.hbm [resolvable:$true] %s463_s18 }
  0x24   : > { %235 = vmatpush.msra.mxu0 %v208_v4  ;;  %s465_s15 = scalar_lea.hbm %s464_s18, 4  ;;  %s469_s22 = scalar_lea.hbm %s684_s3, 8 }
  0x25   : > { %349 = vmatmul.msk.f32.vlgmr.msra.gmra.mxu0 %vm216_vm0, %v209_v5  ;;  %p466_p4 = scmp.ne.s32.totalorder %s464_s18, %s465_s15  ;;  %p470_p7 = scmp.lt.s32.totalorder %s464_s18, %s684_s3 }
  0x26   : > { %p471_p8 = scmp.lt.s32.totalorder %s469_s22, %s465_s15 }
  0x27   : > { %p467_p5 = pnand %p466_p4, %p605_p9 }
  0x28   : > { %p472_p10 = por %p471_p8, %p470_p7 }
  0x29   : > { %p468_p6 = pneg %p467_p5 }
  0x2b   : > { %p473_p13 = pnand %p472_p10, %p468_p6 }
  0x94   : > { %v214_v6 = vpop.permute.xlu0 %213 }
  0xa2   : > { %v237_v7 = vpop.f32.mrf.mxu0 }
  0xa3   : > { %v238_v8 = vadd.f32 %v237_v7, %v214_v6 }
  0xa5   : > { %v240_v9 = vadd.f32 %v418_v2, %v238_v8 }
  0xa7   : > { %242 = vst.msk [vmem:[%s204_s7] sm:$0xf] %vm241_vm1, %v240_v9 }
  0xa8   : > { %476 = shalt.err (!%p473_p13)
}
  0xa9   : > { %356 = dma.vmem_to_hbm [thread:$0]  (%p605_p9), %s258_s8, 64, %s260_s9, %s244_s10  }
  0xaa PF: > { %s271_s11 = sand.u32 1, %s511_s12   ;;  %p363_p0 = pnand %p343_p12, %p612_p11 }
  0xab   : > { %s272_s29 = scalar_lea.sflag [#allocation4], %s271_s11 }
  0xac   : > { %p364_p1 = pneg %p363_p0 }
  0xae   : > { %506 = dma.done.wait (%p364_p1), %s272_s29, 64  }
  0xaf   : > { %508 = vsyncadd (%p364_p1), %s272_s29, 4294967232  ;;  %s19_s17 = sadd.s32 1, %s531_s17   ;;  %s689_s12 = smov %s515_s13 }
  0xb0   : > { %p16_p2 = scmp.ge.s32.totalorder %s19_s17, 4   ;;  %s690_s13 = smov %s519_s14 }
  0xb1   : > { %s691_s14 = smov %s610_s26  ;;  %s692_s15 = smov %s527_s16 }
  0xb2   : > { %s693_s16 = smov %s695_s20  ;;  %18 = sbr.rel (!%p16_p2) target bundleno = 6 (0x6), region = 77 }
  0xb7   :  { %278 = vsyncpa [#allocation3], 1 }
  0xb8   :  { %280 = vsyncpa [#allocation3 + $0x1], 1 }
  0xb9   :  { %281 = vsyncpa [#allocation4], 1 }
  0xba   :  { %283 = vsyncpa [#allocation4 + $0x1], 1 }

</bundles_post_ra>
